<compile_context>
chip_gen: v7x
topology: tpu7x:2x2x1
jax: 0.10.0
libtpu: 0.0.40
codegen_flags: <defaults>
</compile_context>

<pallas_src>
import functools
import math

import jax
import jax.numpy as jnp
from jax.experimental import pallas as pl
from jax.experimental.pallas import tpu as pltpu


# --------------------------------------------------------------------------
# Shared attention core: softmax(q k^T) / sqrt(E) @ v, heads on batch axis.
# --------------------------------------------------------------------------
def _attn_core(qh, kh, vh, inv_scale, mxu_dtype):
    """qh: (H, TQ, D); kh, vh: (H, N, D) in mxu_dtype. Returns (H, TQ, D) f32."""
    s = jnp.einsum('hqd,hkd->hqk', qh, kh,
                   preferred_element_type=jnp.float32)           # (H, TQ, N)
    m = jnp.max(s, axis=-1, keepdims=True)
    p = jnp.exp(s - m)                                           # EUP
    denom = jnp.sum(p, axis=-1, keepdims=True)
    # 1/denom on the EUP; fold post-softmax 1/sqrt(E) into the tiny result.
    inv = pl.reciprocal(denom, approx=True) * inv_scale          # (H, TQ, 1)
    ctx = jnp.einsum('hqk,hkd->hqd', p.astype(mxu_dtype), vh,
                     preferred_element_type=jnp.float32)         # (H, TQ, D)
    return ctx * inv


# --------------------------------------------------------------------------
# Fast path: whole sequence row per grid step (single fused QKV projection).
# --------------------------------------------------------------------------
def _mha_kernel_fullrow(x_ref, wqkv_ref, bqkv_ref, wo_ref, bo_ref, o_ref,
                        *, emb_size, heads):
    """x_ref: (1, N, E); wqkv: (E, 3E); bqkv: (1, 3E); wo: (E, E); bo: (1, E)."""
    E = emb_size
    D = E // heads
    inv_scale = 1.0 / math.sqrt(float(E))
    mxu = wqkv_ref.dtype                     # bf16 on the fast path, f32 otherwise

    x = x_ref[0]                             # (N, E)
    N = x.shape[0]

    # One lane-dense (E, 3E) projection; f32 accumulation; biases added in f32.
    qkv = jnp.dot(x, wqkv_ref[...], preferred_element_type=jnp.float32) + bqkv_ref[...]

    def split(t):                            # 'n (h d) -> h n d'
        return t.reshape(N, heads, D).transpose(1, 0, 2).astype(mxu)

    qh = split(qkv[:, :E])
    kh = split(qkv[:, E:2 * E])
    vh = split(qkv[:, 2 * E:])

    ctx = _attn_core(qh, kh, vh, inv_scale, mxu)          # (H, N, D) f32
    ctx2d = ctx.transpose(1, 0, 2).reshape(N, E)          # 'h n d -> n (h d)'
    y = jnp.dot(ctx2d.astype(mxu), wo_ref[...],
                preferred_element_type=jnp.float32) + bo_ref[...]
    o_ref[0] = y.astype(o_ref.dtype)


# --------------------------------------------------------------------------
# Tiled path: query tiles, K/V projected once per row, carried in VMEM scratch.
# --------------------------------------------------------------------------
def _mha_kernel_tiled(xq_ref, xkv_ref, wq_ref, bq_ref, wkv_ref, bkv_ref,
                      wo_ref, bo_ref, o_ref, kh_ref, vh_ref,
                      *, emb_size, heads):
    """xq_ref: (1, TQ, E); xkv_ref: (1, N, E); kh/vh scratch: (H, N, D) mxu dtype."""
    E = emb_size
    D = E // heads
    inv_scale = 1.0 / math.sqrt(float(E))
    mxu = wq_ref.dtype

    # K/V projection once per batch row; scratch persists across query tiles
    # (query-tile grid axis is "arbitrary" so execution order is sequential).
    @pl.when(pl.program_id(1) == 0)
    def _():
        xkv = xkv_ref[0]                     # (N, E)
        N = xkv.shape[0]
        kv = jnp.dot(xkv, wkv_ref[...],
                     preferred_element_type=jnp.float32) + bkv_ref[...]
        kh_ref[...] = kv[:, :E].reshape(N, heads, D).transpose(1, 0, 2).astype(kh_ref.dtype)
        vh_ref[...] = kv[:, E:].reshape(N, heads, D).transpose(1, 0, 2).astype(vh_ref.dtype)

    xq = xq_ref[0]                           # (TQ, E)
    TQ = xq.shape[0]
    q = jnp.dot(xq, wq_ref[...], preferred_element_type=jnp.float32) + bq_ref[...]
    qh = q.reshape(TQ, heads, D).transpose(1, 0, 2).astype(mxu)   # (H, TQ, D)

    ctx = _attn_core(qh, kh_ref[...], vh_ref[...], inv_scale, mxu)
    ctx2d = ctx.transpose(1, 0, 2).reshape(TQ, E)
    y = jnp.dot(ctx2d.astype(mxu), wo_ref[...],
                preferred_element_type=jnp.float32) + bo_ref[...]
    o_ref[0] = y.astype(o_ref.dtype)


# --------------------------------------------------------------------------
# Wrapper
# --------------------------------------------------------------------------
def multi_head_attention(x, params, *, emb_size, heads,
                         q_tile=None, matmul_dtype=None):
    """x: (B, N, E).  params: weights stored (in, out), biases (1, E).

    matmul_dtype: optional MXU input dtype (e.g. jnp.bfloat16 on v6e/v7x);
    accumulation and softmax stay f32; output keeps x's original dtype.
    """
    B, N, E = x.shape
    assert E == emb_size and E % heads == 0
    out_dtype = x.dtype
    mxu_dtype = matmul_dtype if matmul_dtype is not None else x.dtype
    D = E // heads

    if q_tile is None:
        q_tile = N if N <= 256 else 256
    q_tile = min(q_tile, N)
    assert N % q_tile == 0, "q_tile must divide sequence length"
    n_q = N // q_tile

    wq, bq = params["wq"], params["bq"]
    wk, bk = params["wk"], params["bk"]
    wv, bv = params["wv"], params["bv"]
    wo, bo = params["wo"], params["bo"]

    def cast_w(w):
        return w.astype(matmul_dtype) if matmul_dtype is not None else w

    x_in = x.astype(matmul_dtype) if matmul_dtype is not None else x

    # Advisory cost estimate (4 projections + 2 attention matmuls).
    flops = 8 * B * N * E * E + 4 * B * N * N * E
    weights_bytes = sum(int(a.size) * a.dtype.itemsize
                        for a in (wq, bq, wk, bk, wv, bv, wo, bo))
    bytes_accessed = (int(x_in.size) * x_in.dtype.itemsize + weights_bytes
                      + B * N * E * jnp.dtype(out_dtype).itemsize)
    cost = pl.CostEstimate(flops=int(flops),
                           transcendentals=int(B * heads * N * N),
                           bytes_accessed=int(bytes_accessed))

    if n_q == 1:
        # ---- Full-row path: x DMA'd once, single (E, 3E) fused QKV matmul.
        wqkv = cast_w(jnp.concatenate([wq, wk, wv], axis=1))   # (E, 3E)
        bqkv = jnp.concatenate([bq, bk, bv], axis=1)           # (1, 3E) f32
        kernel = functools.partial(_mha_kernel_fullrow, emb_size=E, heads=heads)
        return pl.pallas_call(
            kernel,
            out_shape=jax.ShapeDtypeStruct((B, N, E), out_dtype),
            grid_spec=pltpu.PrefetchScalarGridSpec(
                num_scalar_prefetch=0,
                grid=(B,),
                in_specs=[
                    pl.BlockSpec((1, N, E), lambda b: (b, 0, 0)),      # x
                    pl.BlockSpec((E, 3 * E), lambda b: (0, 0)),        # wqkv
                    pl.BlockSpec((1, 3 * E), lambda b: (0, 0)),        # bqkv
                    pl.BlockSpec((E, E), lambda b: (0, 0)),            # wo
                    pl.BlockSpec((1, E), lambda b: (0, 0)),            # bo
                ],
                out_specs=pl.BlockSpec((1, N, E), lambda b: (b, 0, 0)),
            ),
            compiler_params=pltpu.CompilerParams(
                dimension_semantics=("parallel",),
                vmem_limit_bytes=32 * 1024 * 1024),
            cost_estimate=cost,
        )(x_in, wqkv, bqkv, cast_w(wo), bo)

    # ---- Tiled path: query tiles; K/V projected once per row into VMEM scratch.
    wkv = cast_w(jnp.concatenate([wk, wv], axis=1))            # (E, 2E)
    bkv = jnp.concatenate([bk, bv], axis=1)                    # (1, 2E) f32
    kernel = functools.partial(_mha_kernel_tiled, emb_size=E, heads=heads)
    return pl.pallas_call(
        kernel,
        out_shape=jax.ShapeDtypeStruct((B, N, E), out_dtype),
        grid_spec=pltpu.PrefetchScalarGridSpec(
            num_scalar_prefetch=0,
            grid=(B, n_q),
            in_specs=[
                pl.BlockSpec((1, q_tile, E), lambda b, qi: (b, qi, 0)),  # x (q tile)
                pl.BlockSpec((1, N, E), lambda b, qi: (b, 0, 0)),        # x (full row)
                pl.BlockSpec((E, E), lambda b, qi: (0, 0)),              # wq
                pl.BlockSpec((1, E), lambda b, qi: (0, 0)),              # bq
                pl.BlockSpec((E, 2 * E), lambda b, qi: (0, 0)),          # wkv
                pl.BlockSpec((1, 2 * E), lambda b, qi: (0, 0)),          # bkv
                pl.BlockSpec((E, E), lambda b, qi: (0, 0)),              # wo
                pl.BlockSpec((1, E), lambda b, qi: (0, 0)),              # bo
            ],
            out_specs=pl.BlockSpec((1, q_tile, E), lambda b, qi: (b, qi, 0)),
            scratch_shapes=[pltpu.VMEM((heads, N, D), mxu_dtype),        # k (head-split)
                            pltpu.VMEM((heads, N, D), mxu_dtype)],       # v (head-split)
        ),
        compiler_params=pltpu.CompilerParams(
            dimension_semantics=("parallel", "arbitrary"),
            vmem_limit_bytes=32 * 1024 * 1024),
        cost_estimate=cost,
    )(x_in, x_in, cast_w(wq), bq, wkv, bkv, cast_w(wo), bo)


# --------------------------------------------------------------------------
# Pure-JAX reference matching the PyTorch forward exactly.
# --------------------------------------------------------------------------
def _reference(x, params, *, emb_size, heads):
    B, N, E = x.shape
    D = E // heads
    q = x @ params["wq"] + params["bq"][0]
    k = x @ params["wk"] + params["bk"][0]
    v = x @ params["wv"] + params["bv"][0]

    def split(t):  # 'b n (h d) -> b h n d'
        return t.reshape(B, N, heads, D).transpose(0, 2, 1, 3)

    q, k, v = split(q), split(k), split(v)
    s = jnp.einsum("bhqd,bhkd->bhqk", q, k)
    a = jax.nn.softmax(s, axis=-1) / math.sqrt(float(emb_size))
    o = jnp.einsum("bhal,bhlv->bhav", a, v)
    o = o.transpose(0, 2, 1, 3).reshape(B, N, E)       # 'b h n d -> b n (h d)'
    return o @ params["wo"] + params["bo"][0]


def _init_params(key, emb_size):
    """Deterministic nn.Linear-style init; weights stored as (in, out)."""
    ks = jax.random.split(key, 8)
    bound = 1.0 / math.sqrt(emb_size)

    def lin(kw, kb):
        w = jax.random.uniform(kw, (emb_size, emb_size), jnp.float32, -bound, bound)
        b = jax.random.uniform(kb, (1, emb_size), jnp.float32, -bound, bound)
        return w, b

    wq, bq = lin(ks[0], ks[1])
    wk, bk = lin(ks[2], ks[3])
    wv, bv = lin(ks[4], ks[5])
    wo, bo = lin(ks[6], ks[7])
    return dict(wq=wq, bq=bq, wk=wk, bk=bk, wv=wv, bv=bv, wo=wo, bo=bo)


if __name__ == "__main__":
    B, N, E, HEADS = 2, 8, 32, 4
    key = jax.random.PRNGKey(0)
    kx, kp, kx2 = jax.random.split(key, 3)

    x = jax.random.normal(kx, (B, N, E), dtype=jnp.float32)
    params = _init_params(kp, E)
    ref = _reference(x, params, emb_size=E, heads=HEADS)

    # 1) f32 full-row path (exact semantics; approx reciprocal only tiny error).
    out = multi_head_attention(x, params, emb_size=E, heads=HEADS)
    out = jax.block_until_ready(out)
    assert out.shape == (B, N, E)
    assert jnp.allclose(out, ref, atol=2e-3, rtol=2e-3), "f32 kernel mismatch"

    # 2) bf16 MXU path (v6e/v7x fast path): f32 accumulation + f32 softmax.
    out_bf16 = multi_head_attention(x, params, emb_size=E, heads=HEADS,
                                    matmul_dtype=jnp.bfloat16)
    out_bf16 = jax.block_until_ready(out_bf16)
    assert jnp.allclose(out_bf16, ref, atol=5e-2, rtol=5e-2), "bf16 kernel mismatch"

    # 3) Tiled query path (exercises the K/V VMEM-scratch carry kernel).
    N2 = 16
    x2 = jax.random.normal(kx2, (B, N2, E), dtype=jnp.float32)
    ref2 = _reference(x2, params, emb_size=E, heads=HEADS)
    out2 = multi_head_attention(x2, params, emb_size=E, heads=HEADS, q_tile=8)
    out2 = jax.block_until_ready(out2)
    assert out2.shape == (B, N2, E)
    assert jnp.allclose(out2, ref2, atol=2e-3, rtol=2e-3), "tiled kernel mismatch"

    print("KERNEL_OK")
</pallas_src>

<mosaic_0001>
module attributes {stable_mosaic.version = 11 : i64} {
  func.func @_mha_kernel_fullrow(%arg0: i32, %arg1: memref<1x8x32xf32, #tpu.memory_space<vmem>>, %arg2: memref<32x96xf32, #tpu.memory_space<vmem>>, %arg3: memref<1x96xf32, #tpu.memory_space<vmem>>, %arg4: memref<32x32xf32, #tpu.memory_space<vmem>>, %arg5: memref<1x32xf32, #tpu.memory_space<vmem>>, %arg6: memref<1x8x32xf32, #tpu.memory_space<vmem>>) attributes {dimension_semantics = [#tpu.dimension_semantics<parallel>], iteration_bounds = array<i64: 2>, scalar_prefetch = 0 : i64, scratch_operands = 0 : i64, tpu.core_type = #tpu.core_type<tc>, window_params = [{transform_indices = @transform_0, window_bounds = array<i64: 1, 8, 32>}, {pipeline_mode = #tpu.pipeline_mode<synchronous>, transform_indices = @transform_1, window_bounds = array<i64: 32, 96>}, {pipeline_mode = #tpu.pipeline_mode<synchronous>, transform_indices = @transform_2, window_bounds = array<i64: 1, 96>}, {pipeline_mode = #tpu.pipeline_mode<synchronous>, transform_indices = @transform_3, window_bounds = array<i64: 32, 32>}, {pipeline_mode = #tpu.pipeline_mode<synchronous>, transform_indices = @transform_4, window_bounds = array<i64: 1, 32>}, {transform_indices = @transform_5, window_bounds = array<i64: 1, 8, 32>}]} {
    %c0 = arith.constant 0 : index
    %c0_0 = arith.constant 0 : index
    %c0_1 = arith.constant 0 : index
    %0 = vector.load %arg1[%c0, %c0_0, %c0_1] : memref<1x8x32xf32, #tpu.memory_space<vmem>>, vector<1x8x32xf32>
    %1 = vector.shape_cast %0 : vector<1x8x32xf32> to vector<8x32xf32>
    %c0_2 = arith.constant 0 : index
    %c0_3 = arith.constant 0 : index
    %2 = vector.load %arg2[%c0_2, %c0_3] : memref<32x96xf32, #tpu.memory_space<vmem>>, vector<32x96xf32>
    %cst = arith.constant dense<0.000000e+00> : vector<8x96xf32>
    %3 = tpu.matmul %1, %2, %cst {dimension_numbers = #tpu.dot_dimension_numbers<[1], [0], [0], [1], [0, 0, 1, 1], [], []>} : vector<8x32xf32>, vector<32x96xf32>, vector<8x96xf32> -> vector<8x96xf32>
    %c0_4 = arith.constant 0 : index
    %c0_5 = arith.constant 0 : index
    %4 = vector.load %arg3[%c0_4, %c0_5] : memref<1x96xf32, #tpu.memory_space<vmem>>, vector<1x96xf32>
    %5 = vector.broadcast %4 : vector<1x96xf32> to vector<8x96xf32>
    %6 = arith.addf %3, %5 : vector<8x96xf32>
    %7 = vector.extract_strided_slice %6 {offsets = [0, 0], sizes = [8, 32], strides = [1, 1]} : vector<8x96xf32> to vector<8x32xf32>
    %8 = vector.shape_cast %7 : vector<8x32xf32> to vector<8x4x8xf32>
    %9 = tpu.transpose %8, [1, 0, 2] : vector<8x4x8xf32> -> vector<4x8x8xf32>
    %10 = vector.extract_strided_slice %6 {offsets = [0, 32], sizes = [8, 32], strides = [1, 1]} : vector<8x96xf32> to vector<8x32xf32>
    %11 = vector.shape_cast %10 : vector<8x32xf32> to vector<8x4x8xf32>
    %12 = tpu.transpose %11, [1, 0, 2] : vector<8x4x8xf32> -> vector<4x8x8xf32>
    %13 = vector.extract_strided_slice %6 {offsets = [0, 64], sizes = [8, 32], strides = [1, 1]} : vector<8x96xf32> to vector<8x32xf32>
    %14 = vector.shape_cast %13 : vector<8x32xf32> to vector<8x4x8xf32>
    %15 = tpu.transpose %14, [1, 0, 2] : vector<8x4x8xf32> -> vector<4x8x8xf32>
    "tpu.trace_start"() <{level = 10 : i32, message = "hqd,hkd->hqk"}> : () -> ()
    %cst_6 = arith.constant dense<0.000000e+00> : vector<4x8x8xf32>
    %16 = tpu.matmul %9, %12, %cst_6 {dimension_numbers = #tpu.dot_dimension_numbers<[2], [2], [1], [1], [0, 0, 0, 1, 1, 1], [0], [0]>} : vector<4x8x8xf32>, vector<4x8x8xf32>, vector<4x8x8xf32> -> vector<4x8x8xf32>
    "tpu.trace_stop"() : () -> ()
    %cst_7 = arith.constant dense<0xFF800000> : vector<4x8xf32>
    %17 = vector.multi_reduction <maximumf>, %16, %cst_7 [2] : vector<4x8x8xf32> to vector<4x8xf32>
    %18 = vector.shape_cast %17 : vector<4x8xf32> to vector<4x8x1xf32>
    %19 = vector.broadcast %18 : vector<4x8x1xf32> to vector<4x8x8xf32>
    %20 = arith.subf %16, %19 : vector<4x8x8xf32>
    %21 = math.exp %20 : vector<4x8x8xf32>
    %cst_8 = arith.constant dense<0.000000e+00> : vector<4x8xf32>
    %22 = vector.multi_reduction <add>, %21, %cst_8 [2] : vector<4x8x8xf32> to vector<4x8xf32>
    %23 = vector.shape_cast %22 : vector<4x8xf32> to vector<4x8x1xf32>
    %24 = tpu.reciprocal %23 {approx = true} : vector<4x8x1xf32> -> vector<4x8x1xf32>
    %cst_9 = arith.constant 0.176776692 : f32
    %25 = vector.broadcast %cst_9 : f32 to vector<4x8x1xf32>
    %26 = arith.mulf %24, %25 : vector<4x8x1xf32>
    "tpu.trace_start"() <{level = 10 : i32, message = "hqk,hkd->hqd"}> : () -> ()
    %cst_10 = arith.constant dense<0.000000e+00> : vector<4x8x8xf32>
    %27 = tpu.matmul %21, %15, %cst_10 {dimension_numbers = #tpu.dot_dimension_numbers<[2], [1], [1], [2], [0, 0, 0, 1, 1, 2], [0], [0]>} : vector<4x8x8xf32>, vector<4x8x8xf32>, vector<4x8x8xf32> -> vector<4x8x8xf32>
    "tpu.trace_stop"() : () -> ()
    %28 = vector.broadcast %26 : vector<4x8x1xf32> to vector<4x8x8xf32>
    %29 = arith.mulf %27, %28 : vector<4x8x8xf32>
    %30 = tpu.transpose %29, [1, 0, 2] : vector<4x8x8xf32> -> vector<8x4x8xf32>
    %31 = vector.shape_cast %30 : vector<8x4x8xf32> to vector<8x32xf32>
    %c0_11 = arith.constant 0 : index
    %c0_12 = arith.constant 0 : index
    %32 = vector.load %arg4[%c0_11, %c0_12] : memref<32x32xf32, #tpu.memory_space<vmem>>, vector<32x32xf32>
    %cst_13 = arith.constant dense<0.000000e+00> : vector<8x32xf32>
    %33 = tpu.matmul %31, %32, %cst_13 {dimension_numbers = #tpu.dot_dimension_numbers<[1], [0], [0], [1], [0, 0, 1, 1], [], []>} : vector<8x32xf32>, vector<32x32xf32>, vector<8x32xf32> -> vector<8x32xf32>
    %c0_14 = arith.constant 0 : index
    %c0_15 = arith.constant 0 : index
    %34 = vector.load %arg5[%c0_14, %c0_15] : memref<1x32xf32, #tpu.memory_space<vmem>>, vector<1x32xf32>
    %35 = vector.broadcast %34 : vector<1x32xf32> to vector<8x32xf32>
    %36 = arith.addf %33, %35 : vector<8x32xf32>
    %c0_16 = arith.constant 0 : index
    %c0_17 = arith.constant 0 : index
    %c0_18 = arith.constant 0 : index
    %37 = vector.load %arg6[%c0_16, %c0_17, %c0_18] : memref<1x8x32xf32, #tpu.memory_space<vmem>>, vector<1x8x32xf32>
    %38 = vector.shape_cast %37 : vector<1x8x32xf32> to vector<8x32xf32>
    %39 = vector.shape_cast %36 : vector<8x32xf32> to vector<1x8x32xf32>
    tpu.vector_store %arg6[%c0_16, %c0_17, %c0_18], %39 {strides = array<i32>} : memref<1x8x32xf32, #tpu.memory_space<vmem>>, vector<1x8x32xf32>,
    return
  }
  func.func @transform_0(%arg0: i32) -> (i32, i32, i32) {
    %c0_i32 = arith.constant 0 : i32
    %c0_i32_0 = arith.constant 0 : i32
    %c0_i32_1 = arith.constant 0 : i32
    return %arg0, %c0_i32, %c0_i32_0 : i32, i32, i32
  }
  func.func @transform_1(%arg0: i32) -> (i32, i32) {
    %c0_i32 = arith.constant 0 : i32
    %c0_i32_0 = arith.constant 0 : i32
    %c0_i32_1 = arith.constant 0 : i32
    return %c0_i32, %c0_i32_0 : i32, i32
  }
  func.func @transform_2(%arg0: i32) -> (i32, i32) {
    %c0_i32 = arith.constant 0 : i32
    %c0_i32_0 = arith.constant 0 : i32
    %c0_i32_1 = arith.constant 0 : i32
    return %c0_i32, %c0_i32_0 : i32, i32
  }
  func.func @transform_3(%arg0: i32) -> (i32, i32) {
    %c0_i32 = arith.constant 0 : i32
    %c0_i32_0 = arith.constant 0 : i32
    %c0_i32_1 = arith.constant 0 : i32
    return %c0_i32, %c0_i32_0 : i32, i32
  }
  func.func @transform_4(%arg0: i32) -> (i32, i32) {
    %c0_i32 = arith.constant 0 : i32
    %c0_i32_0 = arith.constant 0 : i32
    %c0_i32_1 = arith.constant 0 : i32
    return %c0_i32, %c0_i32_0 : i32, i32
  }
  func.func @transform_5(%arg0: i32) -> (i32, i32, i32) {
    %c0_i32 = arith.constant 0 : i32
    %c0_i32_0 = arith.constant 0 : i32
    %c0_i32_1 = arith.constant 0 : i32
    return %arg0, %c0_i32, %c0_i32_0 : i32, i32, i32
  }
}

</mosaic_0001>

<bundles_post_ra>
// kernel: tpu_custom_call.1
= control target key start
LH: loop header
LB: loop body
LE: loop exit
PB: predicated region body
PF: predicated region fallthrough
CT: control target
= control target key end

     0   :  { %10 = vsyncpa [#allocation3], 0  ;;  %s2607_s0 = inlined_call_operand.hbm [shape: f32[2,8,32], index: 0, kind: input, shape index: {}]   ;;  %s2608_s1 = inlined_call_operand.hbm [shape: f32[32,96], index: 1, kind: input, shape index: {}]   ;;  %s2609_s2 = inlined_call_operand.vmem [shape: f32[1,96], index: 2, kind: input, shape index: {}]   ;;  %s2610_s3 = inlined_call_operand.hbm [shape: f32[32,32], index: 3, kind: input, shape index: {}]   ;;  %s2611_s4 = inlined_call_operand.vmem [shape: f32[1,32], index: 4, kind: input, shape index: {}]   ;;  %s2612_s5 = inlined_call_operand.hbm [shape: f32[2,8,32], index: 5, kind: output, shape index: {}]  }
   0x1   :  { %12 = vsyncpa [#allocation3 + $0x1], 0 }
   0x2   :  { %13 = vsyncpa [#allocation6], 0 }
   0x3   :  { %14 = vsyncpa [#allocation4], 0 }
   0x4   :  { %16 = vsyncpa [#allocation4 + $0x1], 0  ;;  %s2228_s18 = smov 0   ;;  %s2230_s19 = smov 0  }
   0x5   :  { %s2232_s20 = smov 0   ;;  %s2234_s21 = smov 0  }
   0x6 LB: > { %s2249_s22 = sadd.s32 4294967295, %s2177_s21   ;;  %s1783_s23 = sadd.s32 4294967294, %s2177_s21   ;;  %s2177_s21 = sphi %s2234_s21, %s2632_s21   ;;  %s2173_s20 = sphi %s2232_s20, %s2631_s20   ;;  %s2169_s19 = sphi %s2230_s19, %s2630_s19   ;;  %s2165_s18 = sphi %s2228_s18, %s2629_s18  }
   0x7   : > { %p42_p0 = scmp.ne.s32.totalorder %s2169_s19, %s2165_s18  ;;  %p2613_p1 = scmp.eq.s32.totalorder %s2249_s22, 0 }
   0x8   : > { %p156_p3 = scmp.eq.s32.totalorder %s1783_s23, 1  ;;  %p1784_p5 = scmp.ge.s32.totalorder %s2177_s21, 1 }
   0x9   : > { %p2258_p4 = por %p2613_p1, %p42_p0  ;;  %p163_p7 = scmp.lt.s32.totalorder %s2177_s21, 3 }
   0xa   : > { %p2263_p6 = por %p156_p3, %p42_p0  ;;  %s2179_s27 = smov [#allocation5]  }
   0xb   : > { %s2616_s24 = scalar_select %p2258_p4, 1, 0 }
   0xc   : > { %s2617_s25 = scalar_select %p2263_p6, 1, 0 }
   0xd   : > { %p2268_p8 = pnand %p1784_p5, %p163_p7  ;;  %s175_s28 = sshll.u32 %s2179_s27, 4  ;;  %s2272_s28 = int_to_ptr.vmem [resolvable:$true] %s175_s28 }
   0xe   : > { %s2180_s30 = smov [#allocation7]   ;;  %s2021_s9 = scalar_lea.hbm %s2608_s1, 512 }
   0xf   : > { %p1935_p9 = pneg %p2268_p8  ;;  %s191_s6 = sshll.u32 %s2180_s30, 4  ;;  %s2283_s6 = int_to_ptr.vmem [resolvable:$true] %s191_s6 }
  0x10   : > { %p2022_p12 = scmp.ne.s32.totalorder %s2608_s1, %s2021_s9  ;;  %p2028_p5 = scmp.lt.u32.totalorder %s2021_s9, %s2608_s1 }
  0x11   : > { %p2279_p11 = pnand %p1935_p9, %p2613_p1 }
  0x13   : > { %p2023_p13 = pneg %p2279_p11 }
  0x15   : > { %p2024_p0 = pnand %p2023_p13, %p2022_p12 }
  0x17   : > { %p2025_p3 = pneg %p2024_p0 }
  0x19   : > { %p2030_p7 = pnand %p2028_p5, %p2025_p3 }
  0x1b   : > { %2033 = shalt.err (!%p2030_p7)
}
  0x1c   : > { %s2034_s14 = scalar_lea.vmem %s2272_s28, 512  ;;  %p2042_p2 = scmp.lt.s32.totalorder %s2272_s28, %s2272_s28 }
  0x1d   : > { %p2035_p9 = scmp.ne.s32.totalorder %s2272_s28, %s2034_s14  ;;  %p2043_p12 = scmp.lt.s32.totalorder %s2034_s14, %s2034_s14 }
  0x1f   : > { %p2037_p10 = pnand %p2035_p9, %p2023_p13  ;;  %p2044_p0 = por %p2043_p12, %p2042_p2 }
  0x21   : > { %p2038_p1 = pneg %p2037_p10 }
  0x23   : > { %p2045_p6 = pnand %p2044_p0, %p2038_p1 }
  0x25   : > { %2048 = shalt.err (!%p2045_p6)
}
  0x26   : > { %s2181_s15 = smov 128   ;;  %s2182_s16 = smov 8  }
  0x27   : > { %1938 = dma.hbm_to_vmem [thread:$0]  (!%p2279_p11), %s2608_s1, 512, %s2272_s28, [#allocation6], %s2181_s15, %s2181_s15, %s2182_s16  }
  0x28   : > { %s2049_s7 = scalar_lea.hbm %s2610_s3, 512 }
  0x29   : > { %p2050_p2 = scmp.ne.s32.totalorder %s2610_s3, %s2049_s7  ;;  %p2056_p10 = scmp.lt.u32.totalorder %s2049_s7, %s2610_s3 }
  0x2b   : > { %p2052_p1 = pnand %p2050_p2, %p2023_p13 }
  0x2d   : > { %p2053_p6 = pneg %p2052_p1 }
  0x2f   : > { %p2058_p3 = pnand %p2056_p10, %p2053_p6 }
  0x31   : > { %2061 = shalt.err (!%p2058_p3)
}
  0x32   : > { %s2062_s28 = scalar_lea.vmem %s2283_s6, 512  ;;  %p2070_p12 = scmp.lt.s32.totalorder %s2283_s6, %s2283_s6 }
  0x33   : > { %p2063_p5 = scmp.ne.s32.totalorder %s2283_s6, %s2062_s28  ;;  %p2071_p0 = scmp.lt.s32.totalorder %s2062_s28, %s2062_s28 }
  0x35   : > { %p2065_p7 = pnand %p2063_p5, %p2023_p13  ;;  %p2072_p2 = por %p2071_p0, %p2070_p12 }
  0x37   : > { %p2066_p9 = pneg %p2065_p7 }
  0x39   : > { %p2073_p1 = pnand %p2072_p2, %p2066_p9 }
  0x3b   : > { %2076 = shalt.err (!%p2073_p1)
}
  0x3c   : > { %1941 = dma.hbm_to_vmem [thread:$0]  (!%p2279_p11), %s2610_s3, 512, %s2283_s6, [#allocation6], %s2181_s15, %s2181_s15, %s2182_s16  }
  0x3d   : > { %s2338_s14 = sadd.s32 1, %s2177_s21   ;;  %s29_s29 = sadd.s32 1, %s2173_s20 }
  0x3e   : > { %s26_s17 = ssub.s32 %s2177_s21, %s2338_s14  ;;  %p36_p13 = scmp.ne.s32.totalorder %s2173_s20, %s2169_s19 }
  0x3f   : > { %p27_p6 = scmp.eq.s32.totalorder %s26_s17, 0  ;;  %p37_p10 = scmp.eq.s32.totalorder %s2177_s21, 0 }
  0x40   : > { %p2620_p3 = scmp.eq.s32.totalorder %s2249_s22, 1  ;;  %p1952_p7 = scmp.lt.s32.totalorder %s2177_s21, 2 }
  0x41   : > { %s2354_s27 = scalar_select %p27_p6, %s2173_s20, %s29_s29  }
  0x42   : > { %p2348_p5 = por %p2620_p3, %p36_p13  ;;  %p38_p9 = por %p37_p10, %p36_p13 }
  0x43   : > { %s208_s30 = sand.u32 1, %s2173_s20   ;;  %s1789_s6 = sshll.u32 %s2177_s21, 7 }
  0x44   : > { %s2621_s23 = scalar_select %p2348_p5, 1, 0 }
  0x45   : > { %s1788_s7 = sshll.u32 %s208_s30, 3  ;;  %s2361_s8 = scalar_lea.hbm %s2607_s0, %s1789_s6 }
  0x46   : > { %s212_s9 = scalar_lea.vmem [#allocation2], %s1788_s7  ;;  %p2365_p11 = pnand %p1952_p7, %p38_p9 }
  0x47   : > { %s219_s10 = sshll.u32 %s212_s9, 4  ;;  %s209_s28 = scalar_lea.sflag [#allocation3], %s208_s30  ;;  %s2363_s10 = int_to_ptr.vmem [resolvable:$true] %s219_s10 }
  0x48   : > { %s2077_s12 = scalar_lea.hbm %s2361_s8, 128  ;;  %p2079_p0 = pneg %p2365_p11 }
  0x49   : > { %p2078_p12 = scmp.ne.s32.totalorder %s2361_s8, %s2077_s12  ;;  %s2082_s17 = scalar_lea.hbm %s2607_s0, 256 }
  0x4a   : > { %p2083_p13 = scmp.lt.u32.totalorder %s2361_s8, %s2607_s0  ;;  %p2084_p6 = scmp.lt.u32.totalorder %s2082_s17, %s2077_s12 }
  0x4b   : > { %p2080_p2 = pnand %p2079_p0, %p2078_p12  ;;  %p2086_p3 = scmp.lt.u32.totalorder %s2077_s12, %s2361_s8 }
  0x4c   : > { %p2085_p10 = por %p2084_p6, %p2083_p13 }
  0x4d   : > { %p2081_p1 = pneg %p2080_p2 }
  0x4e   : > { %p2087_p7 = por %p2086_p3, %p2085_p10 }
  0x50   : > { %p2088_p9 = pnand %p2087_p7, %p2081_p1 }
  0x52   : > { %2091 = shalt.err (!%p2088_p9)
}
  0x53   : > { %s2092_s30 = scalar_lea.vmem %s2363_s10, 128  ;;  %s2183_s15 = smov [#allocation2]  }
  0x54   : > { %p2093_p12 = scmp.ne.s32.totalorder %s2363_s10, %s2092_s30  ;;  %s2097_s16 = sshll.u32 %s2183_s15, 4  ;;  %s2098_s16 = int_to_ptr.vmem [resolvable:$false] %s2097_s16 }
  0x55   : > { %s2099_s9 = scalar_lea.vmem %s2098_s16, 256  ;;  %p2100_p4 = scmp.lt.s32.totalorder %s2363_s10, %s2098_s16 }
  0x56   : > { %p2095_p2 = pnand %p2093_p12, %p2079_p0  ;;  %p2101_p13 = scmp.lt.s32.totalorder %s2099_s9, %s2092_s30 }
  0x58   : > { %p2096_p5 = pneg %p2095_p2  ;;  %p2102_p6 = por %p2101_p13, %p2100_p4 }
  0x5a   : > { %p2103_p10 = pnand %p2102_p6, %p2096_p5 }
  0x5c   : > { %2106 = shalt.err (!%p2103_p10)
}
  0x5d   : > { %1945 = dma.hbm_to_vmem [thread:$0]  (!%p2365_p11), %s2361_s8, 128, %s2363_s10, %s209_s28  }
  0x5e   : > { %228 = sbr.rel (%p2268_p8) target bundleno = 1558 (0x616), region = 40  ;;  %s2397_s12 = sand.u32 (!%p2268_p8), 1, %s2169_s19  }
  0x5f   : > { %s1791_s13 = sshll.u32 (!%p2268_p8), %s2397_s12, 3  ;;  %s231_s29 = scalar_lea.sflag (!%p2268_p8), [#allocation3], %s2397_s12 }
  0x60   : > { %s234_s17 = scalar_lea.vmem (!%p2268_p8), [#allocation2], %s1791_s13  ;;  %p2623_p4 = scmp.ne.s32.totalorder (!%p2268_p8), %s2616_s24, 0 }
  0x65   : > { %2152 = dma.done.wait (%p2623_p4), %s231_s29, 128  }
  0x66   : > { %2154 = vsyncadd (%p2623_p4), %s231_s29, 4294967168  ;;  %p2624_p5 = scmp.eq.s32.totalorder %s2249_s22, 0 }
  0x68   : > { %2156 = dma.done.wait (%p2624_p5), [#allocation6], 1024   ;;  %p2625_p8 = pmov %p2624_p5 }
  0x69   : > { %v2184_v0 = vmov 0.0|0.0   ;;  %vm2185_vm0 = vmmov 0   ;;  %v2186_v1 = vmov 0.0   ;;  %v270_v2 = vld [vmem:[#allocation5] sm:$0xff]  ;;  %v271_v3 = vld [vmem:[#allocation5 + $0x8] sm:$0xff]  ;;  %v272_v4 = vld [vmem:[#allocation5 + $0x10] sm:$0xff]  ;;  %v370_v18 = vlaneseq }
  0x6a   : > { %2158 = vsyncadd (%p2625_p8), [#allocation6], 4294966272  ;;  %1911 = vmatprep.subr.bf16.mxu0 %v2184_v0  ;;  %1857 = vmatprep.mubr.msk.f32.mxu0 %vm2185_vm0, %v2186_v1  ;;  %v1912_v5 = vpack.c.bf16 %v271_v3, %v270_v2  ;;  %v273_v6 = vld [vmem:[#allocation5 + $0x18] sm:$0xff]  ;;  %vm281_vm1 = vcmask 261120   ;;  %v1795_v9 = vld [vmem:[%s2609_s2] ss:$0 sm:$0xff] }
  0x6b   : > { %1860 = vmatprep.subr.mxu1 %v2186_v1  ;;  %1862 = vmatprep.mubr.msk.f32.mxu1 %vm2185_vm0, %v2186_v1  ;;  %v1915_v7 = vpack.c.bf16 %v273_v6, %v272_v4  ;;  %v269_v8 = vld [vmem:[%s234_s17] sm:$0xff]  ;;  %s2187_s8 = smov 104   ;;  %s2188_s10 = smov 120   ;;  %v2192_v16 = vmov 1983009808   ;;  %v371_v20 = vshrl.u32 %v370_v18, 7 }
  0x6c   : > { %1913 = vmatpush3.bf16.msra.mxu0 %v1912_v5  ;;  %s2189_s11 = smov 96   ;;  %s2190_s28 = smov 112   ;;  %v368_v17 = vunpack.c.l.s4 %v2192_v16  ;;  %v2193_v21 = vmov 1934713408   ;;  %vm797_vm2 = vcmask 64512   ;;  %vm1591_vm3 = vcmask 130048  }
  0x6d   : > { %1914 = vmatprep.subr.bf16.mxu0 %v2184_v0  ;;  %s2191_s7 = smov 64   ;;  %v400_v22 = vunpack.c.l.s4 %v2193_v21  ;;  %s2194_s6 = smov 16   ;;  %vm1593_vm4 = vcmask 195584  }
  0x6e   : > { %v369_v19 = vunpack.c.0.s8 %v368_v17  ;;  %s2195_s30 = smov 8   ;;  %s2196_s15 = smov 24  }
  0x6f   : > { %v401_v28 = vunpack.c.0.s8 %v400_v22  ;;  %s1820_s29 = sshll.u32 %s2249_s22, 7  ;;  %s268_s17 = scalar_lea.vmem [#allocation8], %s1791_s13 }
  0x70   : > { %1916 = vmatpush3.bf16.msra.mxu0 %v1915_v7  ;;  %v2435_v25 = vsub.s32 %v369_v19, %v371_v20  ;;  %s1694_s24 = sshll.u32 %s268_s17, 4  ;;  %p2626_p0 = scmp.ne.s32.totalorder %s2621_s23, 0  ;;  %s2564_s24 = int_to_ptr.vmem [resolvable:$true] %s1694_s24 }
  0x71   : > { %1880 = vmatprep.subr.mxu0 %v2186_v1  ;;  %v2443_v33 = vsub.s32 %v401_v28, %v371_v20  ;;  %s2107_s22 = scalar_lea.vmem %s2564_s24, 128  ;;  %s2197_s13 = smov [#allocation8]  }
  0x72   : > { %p2108_p11 = scmp.ne.s32.totalorder %s2564_s24, %s2107_s22 }
  0x73   : > { %1858 = vmatmul.mubr.msk.f32.vlgmr.msra.gmra.mrb[0].mxu0 %vm281_vm1, %v269_v8 }
  0x74   : > { %1882 = vmatprep.mubr.msk.f32.mxu0 %vm2185_vm0, %v2186_v1  ;;  %p2109_p1 = pnand %p2108_p11, %p2626_p0 }
  0x76   : > { %p2110_p3 = pneg %p2109_p1 }
 0x146   : > { %v351_v10 = vpop.f32.mrb[0].mxu0 }
 0x147   : > { %v352_v11 = vadd.f32 %v1795_v9, %v351_v10  ;;  %v1859_v12 = vpop.f32.mrb[1].mxu0 }
 0x149   : > { %362 = vrot.lane.b32.xlu1 %v352_v11, %s2187_s8  ;;  %356 = vrot.lane.b32.xlu0 %v352_v11, %s2188_s10  ;;  %s2562_s10 = scalar_lea.hbm %s2612_s5, %s1820_s29 }
 0x14d   : > { %501 = vrot.lane.b32.xlu1 %v352_v11, %s2189_s11  ;;  %359 = vrot.lane.b32.xlu0 %v352_v11, %s2190_s28  ;;  %s2111_s28 = sshll.u32 %s2197_s13, 4  ;;  %s2112_s28 = int_to_ptr.vmem [resolvable:$false] %s2111_s28 }
 0x14e   : > { %p2114_p7 = scmp.lt.s32.totalorder %s2564_s24, %s2112_s28 }
 0x1bb   : > { %v357_v13 = vpop.permute.xlu0 %356  ;;  %v2425_v14 = vpop.permute.xlu1 %362 }
 0x1bc   : > { %503 = vrot.lane.b32.xlu0 %v357_v13, %s2189_s11  ;;  %v381_v26 = vcombine.low %v357_v13, %v2425_v14  ;;  %v382_v27 = vcombine.high %v357_v13, %v2425_v14 }
 0x1be   : > { %v389_v31 = vrot.slane %v381_v26, %v2435_v25  ;;  %v396_v32 = vrot.slane %v382_v27, %v2435_v25 }
 0x1bf   : > { %v2427_v15 = vpop.permute.xlu0 %359  ;;  %v502_v34 = vpop.permute.xlu1 %501 }
 0x1c0   : > { %507 = vrot.lane.b32.xlu0 %v2425_v14, %s2189_s11  ;;  %505 = vrot.lane.b32.xlu1 %v2427_v15, %s2189_s11  ;;  %v365_v23 = vcombine.low %v352_v11, %v2427_v15  ;;  %v366_v24 = vcombine.high %v352_v11, %v2427_v15  ;;  %s1681_s11 = scalar_lea.sflag [#allocation4], %s2397_s12 }
 0x1c2   : > { %v373_v29 = vrot.slane %v365_v23, %v2435_v25  ;;  %v380_v30 = vrot.slane %v366_v24, %v2435_v25 }
 0x1c4   : > { %649 = vrot.lane.b32.xlu0 %v352_v11, %s2191_s7  ;;  %651 = vrot.lane.b32.xlu1 %v357_v13, %s2191_s7  ;;  %v397_v35 = vcombine.low %v373_v29, %v389_v31  ;;  %v398_v36 = vcombine.high %v373_v29, %v389_v31  ;;  %v413_v37 = vcombine.low %v380_v30, %v396_v32 }
 0x1c5   : > { %v414_v38 = vcombine.high %v380_v30, %v396_v32 }
 0x1c6   : > { %v405_v40 = vrot.slane %v397_v35, %v2443_v33  ;;  %v412_v41 = vrot.slane %v398_v36, %v2443_v33  ;;  %v421_v42 = vrot.slane %v413_v37, %v2443_v33 }
 0x1c7   : > { %v428_v43 = vrot.slane %v414_v38, %v2443_v33 }
 0x1c8   : > { %v433_v54 = vcombine.low %v405_v40, %v412_v41  ;;  %v1797_v55 = vcombine.high %v405_v40, %v412_v41 }
 0x1c9   : > { %v449_v56 = vcombine.low %v421_v42, %v428_v43  ;;  %v1798_v57 = vcombine.high %v421_v42, %v428_v43 }
 0x1ca   : > { %v440_v4 = vrot.slane %v433_v54, %v2435_v25  ;;  %v448_v5 = vrot.slane %v1797_v55, %v2435_v25 }
 0x1cb   : > { %v456_v6 = vrot.slane %v449_v56, %v2435_v25  ;;  %v464_v7 = vrot.slane %v1798_v57, %v2435_v25 }
 0x1cc   : > { %v465_v18 = vcombine.low %v440_v4, %v448_v5  ;;  %v466_v30 = vcombine.high %v440_v4, %v448_v5 }
 0x1cd   : > { %v481_v19 = vcombine.low %v456_v6, %v464_v7  ;;  %v482_v31 = vcombine.high %v456_v6, %v464_v7 }
 0x1ce   : > { %v473_v24 = vrot.slane %v465_v18, %v2443_v33  ;;  %v480_v38 = vrot.slane %v466_v30, %v2443_v33 }
 0x1cf   : > { %v489_v26 = vrot.slane %v481_v19, %v2443_v33 }
 0x1d1   : > { %v497_v32 = vcombine.low %v473_v24, %v489_v26  ;;  %v498_v37 = vcombine.high %v473_v24, %v489_v26 }
 0x22e   : > { %v504_v39 = vpop.permute.xlu0 %503 }
 0x232   : > { %v506_v44 = vpop.permute.xlu1 %505  ;;  %v508_v45 = vpop.permute.xlu0 %507 }
 0x233   : > { %v513_v46 = vcombine.low %v502_v34, %v506_v44  ;;  %v514_v47 = vcombine.high %v502_v34, %v506_v44  ;;  %v529_v48 = vcombine.low %v504_v39, %v508_v45  ;;  %v530_v49 = vcombine.high %v504_v39, %v508_v45 }
 0x234   : > { %v496_v39 = vrot.slane %v482_v31, %v2443_v33 }
 0x235   : > { %v521_v50 = vrot.slane %v513_v46, %v2435_v25  ;;  %v528_v51 = vrot.slane %v514_v47, %v2435_v25  ;;  %v537_v52 = vrot.slane %v529_v48, %v2435_v25  ;;  %v544_v53 = vrot.slane %v530_v49, %v2435_v25 }
 0x236   : > { %v499_v41 = vcombine.low %v480_v38, %v496_v39  ;;  %v500_v43 = vcombine.high %v480_v38, %v496_v39  ;;  %v652_v56 = vpop.permute.xlu1 %651  ;;  %v650_v57 = vpop.permute.xlu0 %649 }
 0x237   : > { %v545_v58 = vcombine.low %v521_v50, %v537_v52  ;;  %v546_v59 = vcombine.high %v521_v50, %v537_v52  ;;  %v561_v60 = vcombine.low %v528_v51, %v544_v53  ;;  %v562_v61 = vcombine.high %v528_v51, %v544_v53 }
 0x239   : > { %v553_v62 = vrot.slane %v545_v58, %v2443_v33  ;;  %v560_v63 = vrot.slane %v546_v59, %v2443_v33  ;;  %v569_v2 = vrot.slane %v561_v60, %v2443_v33  ;;  %v576_v3 = vrot.slane %v562_v61, %v2443_v33 }
 0x23b   : > { %v581_v8 = vcombine.low %v553_v62, %v560_v63  ;;  %v1799_v9 = vcombine.high %v553_v62, %v560_v63  ;;  %v597_v10 = vcombine.low %v569_v2, %v576_v3  ;;  %v1800_v11 = vcombine.high %v569_v2, %v576_v3 }
 0x23d   : > { %v588_v12 = vrot.slane %v581_v8, %v2435_v25  ;;  %v596_v13 = vrot.slane %v1799_v9, %v2435_v25  ;;  %v604_v16 = vrot.slane %v597_v10, %v2435_v25  ;;  %v612_v17 = vrot.slane %v1800_v11, %v2435_v25 }
 0x23f   : > { %v613_v20 = vcombine.low %v588_v12, %v596_v13  ;;  %v629_v21 = vcombine.low %v604_v16, %v612_v17  ;;  %v614_v27 = vcombine.high %v588_v12, %v596_v13  ;;  %v630_v28 = vcombine.high %v604_v16, %v612_v17 }
 0x241   : > { %v621_v22 = vrot.slane %v613_v20, %v2443_v33  ;;  %v637_v23 = vrot.slane %v629_v21, %v2443_v33  ;;  %v628_v35 = vrot.slane %v614_v27, %v2443_v33  ;;  %v644_v36 = vrot.slane %v630_v28, %v2443_v33 }
 0x243   : > { %v645_v29 = vcombine.low %v621_v22, %v637_v23  ;;  %v646_v34 = vcombine.high %v621_v22, %v637_v23  ;;  %v647_v40 = vcombine.low %v628_v35, %v644_v36  ;;  %v648_v42 = vcombine.high %v628_v35, %v644_v36 }
 0x245   : > { %1861 = vmatpush3.xpose.msk.msra.mxu1 %vm797_vm2, %v645_v29 }
 0x246   : > { %1865 = vmatprep.subr.mxu1 %v2186_v1 }
 0x248   : > { %1863 = vmatmul.mubr.msk.f32.vlgmr.msra.gmra.mrb[0].mxu1 %vm797_vm2, %v497_v32 }
 0x249   : > { %1866 = vmatpush3.xpose.msk.msra.mxu1 %vm797_vm2, %v646_v34  ;;  %1867 = vmatprep.mubr.msk.f32.mxu1 %vm2185_vm0, %v2186_v1 }
 0x24a   : > { %1870 = vmatprep.subr.mxu1 %v2186_v1 }
 0x24c   : > { %1868 = vmatmul.mubr.msk.f32.vlgmr.msra.gmra.mrb[2].mxu1 %vm797_vm2, %v498_v37 }
 0x24d   : > { %1871 = vmatpush3.xpose.msk.msra.mxu1 %vm797_vm2, %v647_v40  ;;  %1872 = vmatprep.mubr.msk.f32.mxu1 %vm2185_vm0, %v2186_v1 }
 0x24e   : > { %1875 = vmatprep.subr.mxu1 %v2186_v1 }
 0x250   : > { %1873 = vmatmul.mubr.msk.f32.vlgmr.msra.gmra.mrb[4].mxu1 %vm797_vm2, %v499_v41 }
 0x251   : > { %1876 = vmatpush3.xpose.msk.msra.mxu1 %vm797_vm2, %v648_v42  ;;  %1877 = vmatprep.mubr.msk.f32.mxu1 %vm2185_vm0, %v2186_v1 }
 0x252   : > { %1885 = vmatprep.subr.mxu1 %v2186_v1 }
 0x254   : > { %1878 = vmatmul.mubr.msk.f32.vlgmr.msra.gmra.mrb[6].mxu1 %vm797_vm2, %v500_v43 }
 0x255   : > { %1887 = vmatprep.mubr.msk.f32.mxu1 %vm2185_vm0, %v2186_v1 }
 0x31b   : > { %v870_v44 = vpop.f32.mrb[0].mxu1 }
 0x31c   : > { %v1864_v45 = vpop.f32.mrb[1].mxu1  ;;  %v1102_v46 = vsel %vm797_vm2, %v870_v44, -inf }
 0x31d   : > { %1103 = vmax.xlane.f32.xlu1 %v1102_v46 }
 0x31f   : > { %v946_v47 = vpop.f32.mrb[2].mxu1 }
 0x320   : > { %v1869_v48 = vpop.f32.mrb[3].mxu1  ;;  %v1105_v49 = vsel %vm797_vm2, %v946_v47, -inf }
 0x321   : > { %1106 = vmax.xlane.f32.xlu0 %v1105_v49 }
 0x323   : > { %v1022_v50 = vpop.f32.mrb[4].mxu1 }
 0x324   : > { %v1874_v51 = vpop.f32.mrb[5].mxu1  ;;  %v1108_v52 = vsel %vm797_vm2, %v1022_v50, -inf }
 0x325   : > { %1109 = vmax.xlane.f32.xlu0 %v1108_v52 }
 0x327   : > { %v1098_v53 = vpop.f32.mrb[6].mxu1 }
 0x328   : > { %v1879_v54 = vpop.f32.mrb[7].mxu1  ;;  %v1111_v55 = vsel %vm797_vm2, %v1098_v53, -inf }
 0x329   : > { %1112 = vmax.xlane.f32.xlu1 %v1111_v55 }
 0x33a   : > { %653 = vrot.lane.b32.xlu1 %v2427_v15, %s2191_s7 }
 0x33b   : > { %655 = vrot.lane.b32.xlu0 %v2425_v14, %s2191_s7  ;;  %s2113_s7 = scalar_lea.vmem %s2112_s28, 256 }
 0x33c   : > { %p2115_p9 = scmp.lt.s32.totalorder %s2113_s7, %s2107_s22 }
 0x33e   : > { %p2116_p12 = por %p2115_p9, %p2114_p7 }
 0x340   : > { %p2117_p2 = pnand %p2116_p12, %p2110_p3 }
 0x3aa   : > { %v1104_v58 = vpop.xlane.xlu1 %1103 }
 0x3ab   : > { %v1114_v59 = vsub.f32 %v870_v44, %v1104_v58 }
 0x3ad   : > { %v1118_v60 = vmul.f32 1.442695, %v1114_v59 }
 0x3ae   : > { %v1107_v61 = vpop.xlane.xlu0 %1106 }
 0x3af   : > { %2005 = vpow2.f32 %v1118_v60  ;;  %v1115_v62 = vsub.f32 %v946_v47, %v1107_v61 }
 0x3b1   : > { %v1120_v63 = vmul.f32 1.442695, %v1115_v62 }
 0x3b2   : > { %v1110_v2 = vpop.xlane.xlu0 %1109 }
 0x3b3   : > { %2007 = vpow2.f32 %v1120_v63  ;;  %v1116_v3 = vsub.f32 %v1022_v50, %v1110_v2 }
 0x3b5   : > { %v1122_v4 = vmul.f32 1.442695, %v1116_v3 }
 0x3b6   : > { %v1113_v5 = vpop.xlane.xlu1 %1112  ;;  %v656_v6 = vpop.permute.xlu0 %655 }
 0x3b7   : > { %2009 = vpow2.f32 %v1122_v4  ;;  %v1117_v15 = vsub.f32 %v1098_v53, %v1113_v5  ;;  %v677_v14 = vcombine.low %v652_v56, %v656_v6  ;;  %v678_v9 = vcombine.high %v652_v56, %v656_v6  ;;  %v1595_v56 = vld [vmem:[#allocation7] sm:$0xff] }
 0x3b9   : > { %v2006_v7 = vpop.eup %2005  ;;  %v1124_v8 = vmul.f32 1.442695, %v1117_v15  ;;  %v685_v17 = vrot.slane %v677_v14, %v2435_v25  ;;  %v692_v18 = vrot.slane %v678_v9, %v2435_v25 }
 0x3ba   : > { %v654_v10 = vpop.permute.xlu1 %653  ;;  %v1126_v11 = vsel %vm797_vm2, %v2006_v7, 0.0 }
 0x3bb   : > { %2011 = vpow2.f32 %v1124_v8  ;;  %v661_v12 = vcombine.low %v650_v57, %v654_v10  ;;  %v662_v13 = vcombine.high %v650_v57, %v654_v10  ;;  %1127 = vadd.xlane.f32.xlu1 %v1126_v11  ;;  %v1596_v57 = vld [vmem:[#allocation7 + $0x8] sm:$0xff] }
 0x3bc   : > { %v1918_v58 = vpack.c.bf16 %v1596_v57, %v1595_v56 }
 0x3bd   : > { %v2008_v16 = vpop.eup %2007  ;;  %v669_v19 = vrot.slane %v661_v12, %v2435_v25  ;;  %v676_v20 = vrot.slane %v662_v13, %v2435_v25 }
 0x3be   : > { %v1129_v21 = vsel %vm797_vm2, %v2008_v16, 0.0 }
 0x3bf   : > { %v693_v22 = vcombine.low %v669_v19, %v685_v17  ;;  %v694_v23 = vcombine.high %v669_v19, %v685_v17  ;;  %v709_v24 = vcombine.low %v676_v20, %v692_v18  ;;  %v710_v26 = vcombine.high %v676_v20, %v692_v18  ;;  %1130 = vadd.xlane.f32.xlu0 %v1129_v21 }
 0x3c1   : > { %v2010_v27 = vpop.eup %2009  ;;  %v701_v28 = vrot.slane %v693_v22, %v2443_v33  ;;  %v708_v29 = vrot.slane %v694_v23, %v2443_v33  ;;  %v717_v30 = vrot.slane %v709_v24, %v2443_v33  ;;  %v724_v31 = vrot.slane %v710_v26, %v2443_v33 }
 0x3c2   : > { %v1132_v32 = vsel %vm797_vm2, %v2010_v27, 0.0 }
 0x3c3   : > { %v729_v34 = vcombine.low %v701_v28, %v708_v29  ;;  %v1801_v35 = vcombine.high %v701_v28, %v708_v29  ;;  %v745_v36 = vcombine.low %v717_v30, %v724_v31  ;;  %v1802_v37 = vcombine.high %v717_v30, %v724_v31  ;;  %1133 = vadd.xlane.f32.xlu0 %v1132_v32  ;;  %v1597_v32 = vld [vmem:[#allocation7 + $0x10] sm:$0xff] }
 0x3c5   : > { %v2012_v38 = vpop.eup %2011  ;;  %v736_v39 = vrot.slane %v729_v34, %v2435_v25  ;;  %v744_v40 = vrot.slane %v1801_v35, %v2435_v25  ;;  %v752_v41 = vrot.slane %v745_v36, %v2435_v25  ;;  %v760_v42 = vrot.slane %v1802_v37, %v2435_v25  ;;  %v1598_v34 = vld [vmem:[#allocation7 + $0x18] sm:$0xff] }
 0x3c6   : > { %v1135_v43 = vsel %vm797_vm2, %v2012_v38, 0.0 }
 0x3c7   : > { %1136 = vadd.xlane.f32.xlu1 %v1135_v43  ;;  %v761_v44 = vcombine.low %v736_v39, %v744_v40  ;;  %v777_v45 = vcombine.low %v752_v41, %v760_v42  ;;  %v762_v46 = vcombine.high %v736_v39, %v744_v40  ;;  %v778_v47 = vcombine.high %v752_v41, %v760_v42 }
 0x3c8   : > { %v1921_v39 = vpack.c.bf16 %v1598_v34, %v1597_v32 }
 0x3c9   : > { %v769_v48 = vrot.slane %v761_v44, %v2443_v33  ;;  %v785_v49 = vrot.slane %v777_v45, %v2443_v33  ;;  %v776_v50 = vrot.slane %v762_v46, %v2443_v33  ;;  %v792_v51 = vrot.slane %v778_v47, %v2443_v33 }
 0x3cb   : > { %v793_v52 = vcombine.low %v769_v48, %v785_v49  ;;  %v794_v53 = vcombine.high %v769_v48, %v785_v49  ;;  %v795_v54 = vcombine.low %v776_v50, %v792_v51  ;;  %v796_v55 = vcombine.high %v776_v50, %v792_v51 }
 0x3cd   : > { %1881 = vmatpush3.msra.mxu0 %v793_v52  ;;  %1886 = vmatpush3.msra.mxu1 %v794_v53 }
 0x3ce   : > { %1883 = vmatmul.mubr.msk.f32.vlgmr.msra.gmra.mrb[2].mxu0 %vm797_vm2, %v2006_v7  ;;  %1888 = vmatmul.mubr.msk.f32.vlgmr.msra.gmra.mrb[8].mxu1 %vm797_vm2, %v2008_v16 }
 0x3cf   : > { %1890 = vmatprep.subr.mxu0 %v2186_v1  ;;  %1895 = vmatprep.subr.mxu1 %v2186_v1 }
 0x3d0   : > { %1891 = vmatpush3.msra.mxu0 %v795_v54  ;;  %1896 = vmatpush3.msra.mxu1 %v796_v55 }
 0x3d1   : > { %1892 = vmatprep.mubr.msk.f32.mxu0 %vm2185_vm0, %v2186_v1  ;;  %1897 = vmatprep.mubr.msk.f32.mxu1 %vm2185_vm0, %v2186_v1 }
 0x3d2   : > { %1893 = vmatmul.mubr.msk.f32.vlgmr.msra.gmra.mrb[4].mxu0 %vm797_vm2, %v2010_v27  ;;  %1898 = vmatmul.mubr.msk.f32.vlgmr.msra.gmra.mrb[10].mxu1 %vm797_vm2, %v2012_v38 }
 0x3d3   : > { %1917 = vmatprep.subr.bf16.mxu0 %v2184_v0  ;;  %1908 = vmatprep.mubr.msk.f32.mxu0 %vm2185_vm0, %v2186_v1 }
 0x3d4   : > { %1919 = vmatpush3.bf16.msra.mxu0 %v1918_v58 }
 0x3d5   : > { %1920 = vmatprep.subr.bf16.mxu0 %v2184_v0 }
 0x3d8   : > { %1922 = vmatpush3.bf16.msra.mxu0 %v1921_v39 }
 0x448   : > { %v1128_v60 = vpop.xlane.xlu1 %1127 }
 0x449   : > { %2013 = vrcp.f32 %v1128_v60 }
 0x44c   : > { %v1131_v59 = vpop.xlane.xlu0 %1130 }
 0x44d   : > { %2015 = vrcp.f32 %v1131_v59 }
 0x450   : > { %v1134_v61 = vpop.xlane.xlu0 %1133 }
 0x451   : > { %2017 = vrcp.f32 %v1134_v61 }
 0x453   : > { %v2014_v63 = vpop.eup %2013 }
 0x454   : > { %v1137_v62 = vpop.xlane.xlu1 %1136  ;;  %v1142_v7 = vmul.f32 0.17677669, %v2014_v63 }
 0x455   : > { %2019 = vrcp.f32 %v1137_v62 }
 0x457   : > { %v2016_v2 = vpop.eup %2015 }
 0x458   : > { %v1143_v8 = vmul.f32 0.17677669, %v2016_v2  ;;  %v1817_v2 = vld [vmem:[%s2611_s4] ss:$0 sm:$0xff] }
 0x45b   : > { %v2018_v3 = vpop.eup %2017 }
 0x45c   : > { %v1144_v14 = vmul.f32 0.17677669, %v2018_v3 }
 0x45f   : > { %v2020_v4 = vpop.eup %2019 }
 0x460   : > { %v1145_v0 = vmul.f32 0.17677669, %v2020_v4 }
 0x4a1   : > { %v1215_v5 = vpop.f32.mrb[2].mxu0  ;;  %v1288_v1 = vpop.f32.mrb[8].mxu1 }
 0x4a2   : > { %v1884_v6 = vpop.f32.mrb[3].mxu0  ;;  %v1889_v15 = vpop.f32.mrb[9].mxu1  ;;  %v1438_v11 = vmul.f32 %v1215_v5, %v1142_v7  ;;  %v1439_v12 = vmul.f32 %v1288_v1, %v1143_v8 }
 0x4a5   : > { %v1361_v9 = vpop.f32.mrb[4].mxu0  ;;  %v1434_v10 = vpop.f32.mrb[10].mxu1 }
 0x4a6   : > { %v1440_v13 = vmul.f32 %v1361_v9, %v1144_v14  ;;  %v1441_v16 = vmul.f32 %v1434_v10, %v1145_v0  ;;  %v1894_v17 = vpop.f32.mrb[5].mxu0  ;;  %v1899_v18 = vpop.f32.mrb[11].mxu1 }
 0x4a8   : > { %v1442_v19 = vcombine.low %v1438_v11, %v1440_v13  ;;  %v1443_v20 = vcombine.high %v1438_v11, %v1440_v13  ;;  %v1458_v21 = vcombine.low %v1439_v12, %v1441_v16  ;;  %v1459_v22 = vcombine.high %v1439_v12, %v1441_v16 }
 0x4aa   : > { %v1450_v23 = vrot.slane %v1442_v19, %v2435_v25  ;;  %v1457_v24 = vrot.slane %v1443_v20, %v2435_v25  ;;  %v1466_v26 = vrot.slane %v1458_v21, %v2435_v25  ;;  %v1473_v27 = vrot.slane %v1459_v22, %v2435_v25 }
 0x4ac   : > { %v1474_v28 = vcombine.low %v1450_v23, %v1466_v26  ;;  %v1475_v29 = vcombine.high %v1450_v23, %v1466_v26  ;;  %v1490_v30 = vcombine.low %v1457_v24, %v1473_v27  ;;  %v1491_v31 = vcombine.high %v1457_v24, %v1473_v27 }
 0x4ae   : > { %v1482_v35 = vrot.slane %v1474_v28, %v2443_v33  ;;  %v1489_v36 = vrot.slane %v1475_v29, %v2443_v33  ;;  %v1498_v37 = vrot.slane %v1490_v30, %v2443_v33  ;;  %v1505_v38 = vrot.slane %v1491_v31, %v2443_v33 }
 0x4b0   : > { %v1510_v40 = vcombine.low %v1482_v35, %v1489_v36  ;;  %v1815_v41 = vcombine.high %v1482_v35, %v1489_v36  ;;  %v1526_v42 = vcombine.low %v1498_v37, %v1505_v38  ;;  %v1816_v43 = vcombine.high %v1498_v37, %v1505_v38 }
 0x4b2   : > { %v1517_v44 = vrot.slane %v1510_v40, %v2435_v25  ;;  %v1525_v45 = vrot.slane %v1815_v41, %v2435_v25  ;;  %v1533_v46 = vrot.slane %v1526_v42, %v2435_v25  ;;  %v1541_v47 = vrot.slane %v1816_v43, %v2435_v25 }
 0x4b4   : > { %v1543_v48 = vcombine.high %v1517_v44, %v1525_v45  ;;  %v1559_v49 = vcombine.high %v1533_v46, %v1541_v47  ;;  %v1542_v50 = vcombine.low %v1517_v44, %v1525_v45  ;;  %v1558_v51 = vcombine.low %v1533_v46, %v1541_v47 }
 0x4b6   : > { %v1557_v52 = vrot.slane %v1543_v48, %v2443_v33  ;;  %v1573_v53 = vrot.slane %v1559_v49, %v2443_v33  ;;  %v1550_v54 = vrot.slane %v1542_v50, %v2443_v33  ;;  %v1566_v55 = vrot.slane %v1558_v51, %v2443_v33 }
 0x4b8   : > { %v1576_v56 = vcombine.low %v1557_v52, %v1573_v53  ;;  %v1575_v57 = vcombine.high %v1550_v54, %v1566_v55  ;;  %v1577_v58 = vcombine.high %v1557_v52, %v1573_v53  ;;  %v1574_v59 = vcombine.low %v1550_v54, %v1566_v55 }
 0x4ba   : > { %1583 = vrot.lane.b32.xlu1 %v1576_v56, %s2194_s6  ;;  %1579 = vrot.lane.b32.xlu0 %v1575_v57, %s2195_s30 }
 0x4be   : > { %1587 = vrot.lane.b32.xlu1 %v1577_v58, %s2196_s15 }
 0x52c   : > { %v1584_v25 = vpop.permute.xlu1 %1583  ;;  %v1580_v60 = vpop.permute.xlu0 %1579 }
 0x52d   : > { %v1590_v61 = vsel %vm797_vm2, %v1574_v59, %v1580_v60 }
 0x52e   : > { %v1592_v62 = vsel %vm1591_vm3, %v1590_v61, %v1584_v25 }
 0x530   : > { %v1588_v33 = vpop.permute.xlu1 %1587 }
 0x531   : > { %v1594_v63 = vsel %vm1593_vm4, %v1592_v62, %v1588_v33 }
 0x532   : > { %1909 = vmatmul.mubr.msk.f32.vlgmr.msra.gmra.mrb[6].mxu0 %vm281_vm1, %v1594_v63 }
 0x605   : > { %v1675_v3 = vpop.f32.mrb[6].mxu0 }
 0x606   : > { %v1676_v4 = vadd.f32 %v1817_v2, %v1675_v3  ;;  %v1910_v5 = vpop.f32.mrb[7].mxu0 }
 0x608   : > { %1679 = vst.msk [vmem:[%s268_s17] sm:$0xff] %vm281_vm1, %v1676_v4 }
 0x609   : > { %2120 = shalt.err (!%p2117_p2)
}
 0x60a   : > { %s2121_s12 = scalar_lea.hbm %s2562_s10, 128  ;;  %s2125_s15 = scalar_lea.hbm %s2612_s5, 256 }
 0x60b   : > { %p2122_p13 = scmp.ne.s32.totalorder %s2562_s10, %s2121_s12  ;;  %p2126_p4 = scmp.lt.u32.totalorder %s2562_s10, %s2612_s5 }
 0x60c   : > { %p2127_p5 = scmp.lt.u32.totalorder %s2125_s15, %s2121_s12  ;;  %p2129_p11 = scmp.lt.u32.totalorder %s2121_s12, %s2562_s10 }
 0x60d   : > { %p2123_p6 = pnand %p2122_p13, %p2626_p0 }
 0x60e   : > { %p2128_p8 = por %p2127_p5, %p2126_p4 }
 0x60f   : > { %p2124_p10 = pneg %p2123_p6 }
 0x610   : > { %p2130_p1 = por %p2129_p11, %p2128_p8 }
 0x612   : > { %p2131_p3 = pnand %p2130_p1, %p2124_p10 }
 0x614   : > { %2134 = shalt.err (!%p2131_p3)
}
 0x615   : > { %1933 = dma.vmem_to_hbm [thread:$0]  (%p2626_p0), %s2564_s24, 128, %s2562_s10, %s1681_s11  }
 0x616 PF: > { %s1706_s29 = sand.u32 1, %s2165_s18   ;;  %p2627_p7 = scmp.ne.s32.totalorder %s2617_s25, 0 }
 0x617   : > { %p2628_p9 = scmp.ge.s32.totalorder %s2177_s21, 2  ;;  %s1707_s17 = scalar_lea.sflag [#allocation4], %s1706_s29 }
 0x619   : > { %p1947_p12 = pnand %p2628_p9, %p2627_p7 }
 0x61b   : > { %2160 = dma.done.wait (!%p1947_p12), %s1707_s17, 128  }
 0x61c   : > { %2162 = vsyncadd (!%p1947_p12), %s1707_s17, 4294967168  ;;  %p19_p2 = scmp.ge.s32.totalorder %s2338_s14, 4   ;;  %s2629_s18 = smov %s2169_s19 }
 0x61d   : > { %s2630_s19 = smov %s2173_s20  ;;  %s2631_s20 = smov %s2354_s27 }
 0x61e   : > { %s2632_s21 = smov %s2338_s14  ;;  %21 = sbr.rel (!%p19_p2) target bundleno = 6 (0x6), region = 93 }
 0x625   :  { %1712 = vsyncpa [#allocation3], 1 }
 0x626   :  { %1714 = vsyncpa [#allocation3 + $0x1], 1 }
 0x627   :  { %1715 = vsyncpa [#allocation6], 1 }
 0x628   :  { %1716 = vsyncpa [#allocation4], 1 }
 0x629   :  { %1718 = vsyncpa [#allocation4 + $0x1], 1 }

</bundles_post_ra>
